<compile_context>
chip_gen: v6e
topology: v6e:2x2x1
jax: 0.10.0
libtpu: 0.0.40
codegen_flags: <defaults>
</compile_context>

<pallas_src>
import functools

import jax
import jax.numpy as jnp
from jax.experimental import pallas as pl
from jax.experimental.pallas import tpu as pltpu


def mlp_kernel(x_ref, w1_ref, b1_ref, w2_ref, b2_ref, o_ref):
    # x_ref:  (TM, inp)    w1_ref: (inp, hid)  b1_ref: (1, hid)  [f32]
    # w2_ref: (hid, out)   b2_ref: (1, out)    [f32]
    # o_ref:  (TM, out)
    h = jnp.dot(x_ref[...], w1_ref[...], preferred_element_type=jnp.float32)
    h = jnp.maximum(h + b1_ref[...], 0.0)          # bias-add + ReLU on the VPU (f32)
    # no-op cast in the f32 path; in the bf16 path it feeds the MXU at full rate
    y = jnp.dot(h.astype(w2_ref.dtype), w2_ref[...],
                preferred_element_type=jnp.float32)
    o_ref[...] = (y + b2_ref[...]).astype(o_ref.dtype)


def _round_up(n, m):
    return ((n + m - 1) // m) * m


def user_model_forward(x, w1, b1, w2, b2, *, block_m=512, compute_dtype=None,
                       xla_fallback_batch=0):
    """Forward pass of Linear(inp,hid) -> ReLU -> Linear(hid,out).

    x: (B, inp); w1: (inp, hid); b1: (hid,) or (1, hid); w2: (hid, out);
    b2: (out,) or (1, out).  Returns (B, out) in x.dtype.
    """
    B, inp = x.shape
    hid = w1.shape[1]
    out = w2.shape[1]
    out_dtype = x.dtype

    b1 = b1.reshape(1, hid).astype(jnp.float32)
    b2 = b2.reshape(1, out).astype(jnp.float32)

    # Tiny batches: plain XLA GEMM already optimal; kernel launch not worth it.
    # (Disabled by default so tests always exercise the Pallas path.)
    if B <= xla_fallback_batch:
        y = jnp.maximum(x @ w1 + b1, 0.0) @ w2 + b2
        return y.astype(out_dtype)

    # Mixed-precision operands (v6e/v7x): cast activations + weights only;
    # biases, accumulation, bias-add and ReLU stay f32.
    if compute_dtype is not None:
        x = x.astype(compute_dtype)
        w1 = w1.astype(compute_dtype)
        w2 = w2.astype(compute_dtype)

    # ---- batch tiling (no padding; Pallas masks the ragged edge block) -------
    if B <= 8:
        tm = B                                     # full-extent block, 1 step
    else:
        # keep >=2 grid steps when possible so v7x's two TCs both get work,
        # while never exceeding block_m rows per tile.
        tm = min(block_m, _round_up(pl.cdiv(B, 2), 8))
    grid = (pl.cdiv(B, tm),)

    esize = jnp.dtype(x.dtype).itemsize
    cost = pl.CostEstimate(
        flops=2 * B * (inp * hid + hid * out),
        transcendentals=0,
        bytes_accessed=(B * inp * esize + inp * hid * esize + hid * out * esize
                        + hid * 4 + out * 4 + B * out * jnp.dtype(out_dtype).itemsize),
    )

    return pl.pallas_call(
        mlp_kernel,
        out_shape=jax.ShapeDtypeStruct((B, out), out_dtype),
        grid_spec=pl.GridSpec(
            grid=grid,
            in_specs=[
                pl.BlockSpec((tm, inp), lambda i: (i, 0)),   # x tile per grid step
                pl.BlockSpec((inp, hid), lambda i: (0, 0)),  # weights stay resident
                pl.BlockSpec((1, hid), lambda i: (0, 0)),
                pl.BlockSpec((hid, out), lambda i: (0, 0)),
                pl.BlockSpec((1, out), lambda i: (0, 0)),
            ],
            out_specs=pl.BlockSpec((tm, out), lambda i: (i, 0)),
        ),
        compiler_params=pltpu.CompilerParams(
            dimension_semantics=("parallel",)),   # batch axis: megacore-shardable
        cost_estimate=cost,
    )(x, w1, b1, w2, b2)


def _reference(x, w1, b1, w2, b2):
    return jnp.maximum(x @ w1 + b1.reshape(1, -1), 0.0) @ w2 + b2.reshape(1, -1)


if __name__ == "__main__":
    # Shapes implied by the module: Linear(inp, hid) -> ReLU -> Linear(hid, out)
    INP, HID, OUT = 32, 64, 16

    key = jax.random.PRNGKey(0)
    kx, kw1, kb1, kw2, kb2, kx2 = jax.random.split(key, 6)

    lim1 = 1.0 / jnp.sqrt(INP)
    lim2 = 1.0 / jnp.sqrt(HID)
    w1 = jax.random.uniform(kw1, (INP, HID), minval=-lim1, maxval=lim1, dtype=jnp.float32)
    b1 = jax.random.uniform(kb1, (HID,), minval=-lim1, maxval=lim1, dtype=jnp.float32)
    w2 = jax.random.uniform(kw2, (HID, OUT), minval=-lim2, maxval=lim2, dtype=jnp.float32)
    b2 = jax.random.uniform(kb2, (OUT,), minval=-lim2, maxval=lim2, dtype=jnp.float32)

    fwd = jax.jit(functools.partial(user_model_forward, block_m=512))

    # Small batch: single full-extent block (exact f32 path).
    x_small = jax.random.normal(kx, (8, INP), dtype=jnp.float32)
    y_small = fwd(x_small, w1, b1, w2, b2)
    jax.block_until_ready(y_small)
    ref_small = _reference(x_small, w1, b1, w2, b2)
    assert y_small.shape == (8, OUT)
    assert jnp.allclose(y_small, ref_small, atol=1e-5, rtol=1e-5)

    # Larger batch: 2 grid steps with a ragged (masked) edge block.
    x_big = jax.random.normal(kx2, (200, INP), dtype=jnp.float32)
    y_big = fwd(x_big, w1, b1, w2, b2)
    jax.block_until_ready(y_big)
    ref_big = _reference(x_big, w1, b1, w2, b2)
    assert y_big.shape == (200, OUT)
    assert jnp.allclose(y_big, ref_big, atol=1e-5, rtol=1e-5)

    # Opt-in bf16 operand path (recommended on v6e/v7x): looser tolerance.
    fwd_bf16 = jax.jit(functools.partial(user_model_forward, block_m=512,
                                         compute_dtype=jnp.bfloat16))
    y_bf16 = fwd_bf16(x_big, w1, b1, w2, b2)
    jax.block_until_ready(y_bf16)
    assert y_bf16.shape == (200, OUT)
    assert jnp.allclose(y_bf16, ref_big, atol=5e-2, rtol=5e-2)

    print("KERNEL_OK")
</pallas_src>

<mosaic_0001>
module attributes {stable_mosaic.version = 11 : i64} {
  func.func @mlp_kernel(%arg0: i32, %arg1: memref<8x32xf32, #tpu.memory_space<vmem>>, %arg2: memref<32x64xf32, #tpu.memory_space<vmem>>, %arg3: memref<1x64xf32, #tpu.memory_space<vmem>>, %arg4: memref<64x16xf32, #tpu.memory_space<vmem>>, %arg5: memref<1x16xf32, #tpu.memory_space<vmem>>, %arg6: memref<8x16xf32, #tpu.memory_space<vmem>>) attributes {dimension_semantics = [#tpu.dimension_semantics<parallel>], iteration_bounds = array<i64: 1>, scalar_prefetch = 0 : i64, scratch_operands = 0 : i64, tpu.core_type = #tpu.core_type<tc>, window_params = [{transform_indices = @transform_0, window_bounds = array<i64: 8, 32>}, {pipeline_mode = #tpu.pipeline_mode<synchronous>, transform_indices = @transform_1, window_bounds = array<i64: 32, 64>}, {pipeline_mode = #tpu.pipeline_mode<synchronous>, transform_indices = @transform_2, window_bounds = array<i64: 1, 64>}, {pipeline_mode = #tpu.pipeline_mode<synchronous>, transform_indices = @transform_3, window_bounds = array<i64: 64, 16>}, {pipeline_mode = #tpu.pipeline_mode<synchronous>, transform_indices = @transform_4, window_bounds = array<i64: 1, 16>}, {transform_indices = @transform_5, window_bounds = array<i64: 8, 16>}]} {
    %c0 = arith.constant 0 : index
    %c0_0 = arith.constant 0 : index
    %0 = vector.load %arg1[%c0, %c0_0] : memref<8x32xf32, #tpu.memory_space<vmem>>, vector<8x32xf32>
    %c0_1 = arith.constant 0 : index
    %c0_2 = arith.constant 0 : index
    %1 = vector.load %arg2[%c0_1, %c0_2] : memref<32x64xf32, #tpu.memory_space<vmem>>, vector<32x64xf32>
    %cst = arith.constant dense<0.000000e+00> : vector<8x64xf32>
    %2 = tpu.matmul %0, %1, %cst {dimension_numbers = #tpu.dot_dimension_numbers<[1], [0], [0], [1], [0, 0, 1, 1], [], []>} : vector<8x32xf32>, vector<32x64xf32>, vector<8x64xf32> -> vector<8x64xf32>
    %c0_3 = arith.constant 0 : index
    %c0_4 = arith.constant 0 : index
    %3 = vector.load %arg3[%c0_3, %c0_4] : memref<1x64xf32, #tpu.memory_space<vmem>>, vector<1x64xf32>
    %4 = vector.broadcast %3 : vector<1x64xf32> to vector<8x64xf32>
    %5 = arith.addf %2, %4 : vector<8x64xf32>
    %cst_5 = arith.constant 0.000000e+00 : f32
    %6 = vector.broadcast %cst_5 : f32 to vector<8x64xf32>
    %7 = arith.maximumf %5, %6 : vector<8x64xf32>
    %c0_6 = arith.constant 0 : index
    %c0_7 = arith.constant 0 : index
    %8 = vector.load %arg4[%c0_6, %c0_7] : memref<64x16xf32, #tpu.memory_space<vmem>>, vector<64x16xf32>
    %cst_8 = arith.constant dense<0.000000e+00> : vector<8x16xf32>
    %9 = tpu.matmul %7, %8, %cst_8 {dimension_numbers = #tpu.dot_dimension_numbers<[1], [0], [0], [1], [0, 0, 1, 1], [], []>} : vector<8x64xf32>, vector<64x16xf32>, vector<8x16xf32> -> vector<8x16xf32>
    %c0_9 = arith.constant 0 : index
    %c0_10 = arith.constant 0 : index
    %10 = vector.load %arg5[%c0_9, %c0_10] : memref<1x16xf32, #tpu.memory_space<vmem>>, vector<1x16xf32>
    %11 = vector.broadcast %10 : vector<1x16xf32> to vector<8x16xf32>
    %12 = arith.addf %9, %11 : vector<8x16xf32>
    %c0_11 = arith.constant 0 : index
    %c0_12 = arith.constant 0 : index
    %13 = vector.load %arg6[%c0_11, %c0_12] : memref<8x16xf32, #tpu.memory_space<vmem>>, vector<8x16xf32>
    tpu.vector_store %arg6[%c0_11, %c0_12], %12 {strides = array<i32>} : memref<8x16xf32, #tpu.memory_space<vmem>>, vector<8x16xf32>,
    return
  }
  func.func @transform_0(%arg0: i32) -> (i32, i32) {
    %c0_i32 = arith.constant 0 : i32
    %c0_i32_0 = arith.constant 0 : i32
    return %arg0, %c0_i32 : i32, i32
  }
  func.func @transform_1(%arg0: i32) -> (i32, i32) {
    %c0_i32 = arith.constant 0 : i32
    %c0_i32_0 = arith.constant 0 : i32
    %c0_i32_1 = arith.constant 0 : i32
    return %c0_i32, %c0_i32_0 : i32, i32
  }
  func.func @transform_2(%arg0: i32) -> (i32, i32) {
    %c0_i32 = arith.constant 0 : i32
    %c0_i32_0 = arith.constant 0 : i32
    %c0_i32_1 = arith.constant 0 : i32
    return %c0_i32, %c0_i32_0 : i32, i32
  }
  func.func @transform_3(%arg0: i32) -> (i32, i32) {
    %c0_i32 = arith.constant 0 : i32
    %c0_i32_0 = arith.constant 0 : i32
    %c0_i32_1 = arith.constant 0 : i32
    return %c0_i32, %c0_i32_0 : i32, i32
  }
  func.func @transform_4(%arg0: i32) -> (i32, i32) {
    %c0_i32 = arith.constant 0 : i32
    %c0_i32_0 = arith.constant 0 : i32
    %c0_i32_1 = arith.constant 0 : i32
    return %c0_i32, %c0_i32_0 : i32, i32
  }
  func.func @transform_5(%arg0: i32) -> (i32, i32) {
    %c0_i32 = arith.constant 0 : i32
    %c0_i32_0 = arith.constant 0 : i32
    return %arg0, %c0_i32 : i32, i32
  }
}

</mosaic_0001>

<bundles_post_ra>
// kernel: user_model_forward.1
= control target key start
LH: loop header
LB: loop body
LE: loop exit
PB: predicated region body
PF: predicated region fallthrough
CT: control target
= control target key end

     0   :  { %v286_v1 = vmov 0.0   ;;  %vm287_vm0 = vmmov 0   ;;  %s369_s0 = inlined_call_operand.vmem [shape: f32[8,32], index: 0, kind: input, shape index: {}]   ;;  %s370_s1 = inlined_call_operand.vmem [shape: f32[32,64], index: 1, kind: input, shape index: {}]   ;;  %s371_s2 = inlined_call_operand.vmem [shape: f32[1,64], index: 2, kind: input, shape index: {}]   ;;  %s372_s3 = inlined_call_operand.vmem [shape: f32[64,16], index: 3, kind: input, shape index: {}]   ;;  %s373_s4 = inlined_call_operand.vmem [shape: f32[1,16], index: 4, kind: input, shape index: {}]   ;;  %s374_s5 = inlined_call_operand.hbm [shape: f32[8,16], index: 5, kind: output, shape index: {}]  }
   0x1   :  { %v25_v0 = vld [vmem:[%s370_s1 + $0x18] sm:$0xff]  ;;  %231 = vmatprep.subr.mxu0 %v286_v1  ;;  %v24_v2 = vld [vmem:[%s370_s1 + $0x10] sm:$0xff]  ;;  %239 = vmatprep.mubr.msk.f32.mxu0 %vm287_vm0, %v286_v1  ;;  %v23_v5 = vld [vmem:[%s370_s1 + $0x8] sm:$0xff] }
   0x2   :  { %v115_v3 = vld [vmem:[%s372_s3 + $0x38] sm:$0xff]  ;;  %232 = vmatpush3.msra.mxu0 %v25_v0  ;;  %242 = vmatprep.subr.mxu1 %v286_v1  ;;  %v114_v4 = vld [vmem:[%s372_s3 + $0x30] sm:$0xff] }
   0x3   :  { %233 = vmatprep.subr.mxu0 %v286_v1  ;;  %243 = vmatpush3.msra.mxu1 %v115_v3 }
   0x4   :  { %10 = vsyncpa [#allocation3], 0  ;;  %234 = vmatpush3.msra.mxu0 %v24_v2  ;;  %244 = vmatprep.subr.mxu1 %v286_v1  ;;  %v113_v6 = vld [vmem:[%s372_s3 + $0x28] sm:$0xff]  ;;  %v22_v7 = vld [vmem:[%s370_s1] sm:$0xff]  ;;  %vm33_vm1 = vcmask 261120   ;;  %vm123_vm2 = vcmask 523264  }
   0x5   :  { %235 = vmatprep.subr.mxu0 %v286_v1  ;;  %245 = vmatpush3.msra.mxu1 %v114_v4  ;;  %v21_v8 = vld [vmem:[%s369_s0] sm:$0xff]  ;;  %v111_v10 = vld [vmem:[%s372_s3 + $0x18] sm:$0xff]  ;;  %v110_v11 = vld [vmem:[%s372_s3 + $0x10] sm:$0xff]  ;;  %s288_s21 = smov [#allocation2]   ;;  %vm197_vm3 = vcmask 130048  }
   0x6   :  { %236 = vmatpush3.msra.mxu0 %v23_v5  ;;  %246 = vmatprep.subr.mxu1 %v286_v1  ;;  %v112_v9 = vld [vmem:[%s372_s3 + $0x20] sm:$0xff]  ;;  %v109_v12 = vld [vmem:[%s372_s3 + $0x8] sm:$0xff]  ;;  %s205_s22 = sshll.u32 %s288_s21, 4  ;;  %s206_s22 = int_to_ptr.vmem [resolvable:$true] %s205_s22 }
   0x7   :  { %237 = vmatprep.subr.mxu0 %v286_v1  ;;  %247 = vmatpush3.msra.mxu1 %v113_v6  ;;  %v108_v13 = vld [vmem:[%s372_s3] sm:$0xff]  ;;  %s264_s3 = scalar_lea.vmem %s206_s22, 128  ;;  %p269_p1 = scmp.lt.s32.totalorder %s206_s22, %s206_s22 }
   0x8   :  { %238 = vmatpush3.msra.mxu0 %v22_v7  ;;  %248 = vmatprep.subr.mxu1 %v286_v1  ;;  %v213_v14 = vld [vmem:[%s371_s2] ss:$0 sm:$0xff]  ;;  %p265_p0 = scmp.ne.s32.totalorder %s206_s22, %s264_s3  ;;  %p270_p2 = scmp.lt.s32.totalorder %s264_s3, %s264_s3 }
   0x9   :  { %240 = vmatmul.mubr.msk.f32.vlgmr.msra.gmra.mxu0 %vm33_vm1, %v21_v8  ;;  %249 = vmatpush3.msra.mxu1 %v112_v9  ;;  %v215_v19 = vld [vmem:[%s373_s4] ss:$0 sm:$0xff] }
   0xa   :  { %250 = vmatprep.subr.mxu1 %v286_v1  ;;  %258 = vmatprep.mubr.msk.f32.mxu1 %vm287_vm0, %v286_v1  ;;  %p271_p3 = por %p270_p2, %p269_p1 }
   0xb   :  { %251 = vmatpush3.msra.mxu1 %v111_v10 }
   0xc   :  { %252 = vmatprep.subr.mxu1 %v286_v1  ;;  %p272_p4 = pnand %p271_p3, %p265_p0 }
   0xd   :  { %253 = vmatpush3.msra.mxu1 %v110_v11 }
   0xe   :  { %254 = vmatprep.subr.mxu1 %v286_v1 }
   0xf   :  { %255 = vmatpush3.msra.mxu1 %v109_v12 }
  0x10   :  { %256 = vmatprep.subr.mxu1 %v286_v1 }
  0x11   :  { %257 = vmatpush3.msra.mxu1 %v108_v13 }
  0xc9   :  { %v103_v15 = vpop.f32.mrf.mxu0 }
  0xca   :  { %v104_v16 = vadd.f32 %v213_v14, %v103_v15 }
  0xcb   :  { %v241_v17 = vpop.f32.mrf.mxu0 }
  0xcc   :  { %v107_v18 = vmax.f32 %v104_v16, 0.0 }
  0xce   :  { %259 = vmatmul.mubr.msk.f32.vlgmr.msra.gmra.mxu1 %vm123_vm2, %v107_v18 }
 0x18e   :  { %v193_v20 = vpop.f32.mrf.mxu1 }
 0x18f   :  { %v194_v21 = vadd.f32 %v215_v19, %v193_v20 }
 0x190   :  { %v260_v22 = vpop.f32.mrf.mxu1 }
 0x191   :  { %198 = vst.msk [vmem:[#allocation2] sm:$0xff] %vm197_vm3, %v194_v21 }
 0x192   :  { %275 = shalt.err (!%p272_p4)
}
 0x193   :  { %208 = dma.vmem_to_hbm [thread:$0]  %s206_s22, 128, %s374_s5, [#allocation3]  }
 0x194   :  { %284 = dma.done.wait [#allocation3], 128  }
 0x195   :  { %285 = vsyncadd [#allocation3], 4294967168 }
 0x196   :  { %212 = vsyncpa [#allocation3], 1 }

</bundles_post_ra>
